<compile_context>
chip_gen: v5e
topology: v5e:2x2
jax: 0.10.0
libtpu: 0.0.40
codegen_flags: <defaults>
</compile_context>

<pallas_src>
import jax
import jax.numpy as jnp
from jax.experimental import pallas as pl
from jax.experimental.pallas import tpu as pltpu


def _outconv_kernel(x_ref, w_ref, b_ref, o_ref):
    # x_ref: (C_in, tile_hw)   w_ref: (C_out, C_in)
    # b_ref: (C_out, 1)        o_ref: (C_out, tile_hw)
    acc = jnp.dot(w_ref[...], x_ref[...], preferred_element_type=jnp.float32)
    o_ref[...] = (acc + b_ref[...]).astype(o_ref.dtype)


def _round_up(x, m):
    return (x + m - 1) // m * m


def _pick_tile_hw(hw, n, c_in, c_out, itemsize):
    """Lane tile: multiple of 128, a few MiB per step, many grid steps."""
    # Sublane packing: 8 rows/vreg for 4-byte, 16 for 2-byte, 32 for 1-byte.
    pack = max(1, 32 // itemsize)
    c_in_pad = _round_up(c_in, pack)
    c_out_pad = _round_up(c_out, pack)
    # Bytes per lane: double-buffered input + output blocks (sublane padded)
    # plus the f32 accumulator temp materialized in the body.
    per_lane = 2 * (c_in_pad + c_out_pad) * itemsize + _round_up(c_out, 8) * 4
    target_bytes = 6 << 20          # ~6 MiB/step: already past the HBM roofline
    tile = max(128, (target_bytes // per_lane) // 128 * 128)
    if hw <= tile:
        return hw                   # full-extent lane block (legal for any hw)
    # Keep enough grid steps for deep pipelining and both v7x TensorCores.
    min_steps = 16
    want_tiles = max(1, -(-min_steps // n))          # ceil(min_steps / n)
    step_cap = max(128, (hw // want_tiles) // 128 * 128)
    return min(tile, step_cap)


@jax.jit
def outconv_forward(x_nchw, weight, bias):
    """1x1 Conv2d forward (PyTorch nn.Conv2d(C_in, C_out, kernel_size=1)).

    x_nchw : (N, C_in, H, W)
    weight : (C_out, C_in, 1, 1)   (PyTorch Conv2d weight layout)
    bias   : (C_out,)
    returns: (N, C_out, H, W)
    """
    N, C_in, H, W = x_nchw.shape
    C_out = weight.shape[0]
    HW = H * W

    itemsize = jnp.dtype(x_nchw.dtype).itemsize
    tile_hw = _pick_tile_hw(HW, N, C_in, C_out, itemsize)
    num_hw_tiles = pl.cdiv(HW, tile_hw)

    x3 = x_nchw.reshape(N, C_in, HW)      # free reshape, native NCHW order
    w_mat = weight.reshape(C_out, C_in)   # free reshape
    b_col = bias.reshape(C_out, 1)        # broadcasts along the lane dim

    grid = (num_hw_tiles, N)              # big spatial axis leading (megacore)

    # Sublane-padding-aware VMEM estimate: pipelined in/out blocks, resident
    # weight/bias blocks (double-buffered), f32 accumulator temp, plus
    # headroom.  Capped at 48 MiB so v7x (64 MiB physical) always has margin.
    pack = max(1, 32 // itemsize)
    c_in_pad = _round_up(C_in, pack)
    c_out_pad = _round_up(C_out, pack)
    block_bytes = tile_hw * (2 * (c_in_pad + c_out_pad) * itemsize
                             + _round_up(C_out, 8) * 4)
    param_bytes = 2 * (c_out_pad * _round_up(C_in, 128)
                       + c_out_pad * 128) * itemsize
    vmem_limit = int(min(48 << 20,
                         max(block_bytes + param_bytes + (8 << 20), 16 << 20)))

    cost = pl.CostEstimate(
        flops=2 * N * HW * C_in * C_out,
        transcendentals=0,
        bytes_accessed=(N * HW * (C_in + C_out) + C_out * C_in + C_out)
        * itemsize,
    )

    y3 = pl.pallas_call(
        _outconv_kernel,
        out_shape=jax.ShapeDtypeStruct((N, C_out, HW), x_nchw.dtype),
        grid_spec=pltpu.PrefetchScalarGridSpec(
            num_scalar_prefetch=0,
            grid=grid,
            in_specs=[
                pl.BlockSpec((pl.Squeezed(), C_in, tile_hw),
                             lambda j, n: (n, 0, j)),
                pl.BlockSpec((C_out, C_in), lambda j, n: (0, 0)),
                pl.BlockSpec((C_out, 1), lambda j, n: (0, 0)),
            ],
            out_specs=pl.BlockSpec((pl.Squeezed(), C_out, tile_hw),
                                   lambda j, n: (n, 0, j)),
        ),
        compiler_params=pltpu.CompilerParams(
            dimension_semantics=("parallel", "parallel"),
            vmem_limit_bytes=vmem_limit,
        ),
        cost_estimate=cost,
    )(x3, w_mat, b_col)

    return y3.reshape(N, C_out, H, W)     # free reshape back to NCHW


def _reference(x_nchw, weight, bias):
    # Pure-JAX reference of Conv2d(kernel_size=1).
    w = weight.reshape(weight.shape[0], weight.shape[1])  # (C_out, C_in)
    return jnp.einsum("nchw,oc->nohw", x_nchw, w) + bias[None, :, None, None]


if __name__ == "__main__":
    key = jax.random.PRNGKey(0)
    k_x, k_w, k_b = jax.random.split(key, 3)

    N, C_in, H, W = 2, 4, 16, 16
    C_out = 3

    x = jax.random.normal(k_x, (N, C_in, H, W), dtype=jnp.float32)
    # Deterministic parameter init (PyTorch-like uniform bound 1/sqrt(fan_in)).
    bound = 1.0 / jnp.sqrt(C_in * 1 * 1)
    weight = jax.random.uniform(k_w, (C_out, C_in, 1, 1), jnp.float32, -bound, bound)
    bias = jax.random.uniform(k_b, (C_out,), jnp.float32, -bound, bound)

    y = outconv_forward(x, weight, bias)
    jax.block_until_ready(y)

    y_ref = _reference(x, weight, bias)
    assert y.shape == (N, C_out, H, W)
    assert jnp.allclose(y, y_ref, atol=1e-5, rtol=1e-5)

    print("KERNEL_OK")
</pallas_src>

<mosaic_0001>
module attributes {stable_mosaic.version = 11 : i64} {
  func.func @_outconv_kernel(%arg0: i32, %arg1: i32, %arg2: memref<1x4x256xf32, #tpu.memory_space<vmem>>, %arg3: memref<3x4xf32, #tpu.memory_space<vmem>>, %arg4: memref<3x1xf32, #tpu.memory_space<vmem>>, %arg5: memref<1x3x256xf32, #tpu.memory_space<vmem>>) attributes {dimension_semantics = [#tpu.dimension_semantics<parallel>, #tpu.dimension_semantics<parallel>], iteration_bounds = array<i64: 1, 2>, scalar_prefetch = 0 : i64, scratch_operands = 0 : i64, tpu.core_type = #tpu.core_type<tc>, window_params = [{transform_indices = @transform_0, window_bounds = array<i64: 1, 4, 256>}, {pipeline_mode = #tpu.pipeline_mode<synchronous>, transform_indices = @transform_1, window_bounds = array<i64: 3, 4>}, {pipeline_mode = #tpu.pipeline_mode<synchronous>, transform_indices = @transform_2, window_bounds = array<i64: 3, 1>}, {transform_indices = @transform_3, window_bounds = array<i64: 1, 3, 256>}]} {
    %c0 = arith.constant 0 : index
    %c0_0 = arith.constant 0 : index
    %0 = vector.load %arg3[%c0, %c0_0] : memref<3x4xf32, #tpu.memory_space<vmem>>, vector<3x4xf32>
    %c0_1 = arith.constant 0 : index
    %c0_2 = arith.constant 0 : index
    %c0_3 = arith.constant 0 : index
    %1 = vector.load %arg2[%c0_1, %c0_2, %c0_3] : memref<1x4x256xf32, #tpu.memory_space<vmem>>, vector<1x4x256xf32>
    %2 = vector.shape_cast %1 : vector<1x4x256xf32> to vector<4x256xf32>
    %cst = arith.constant dense<0.000000e+00> : vector<3x256xf32>
    %3 = tpu.matmul %0, %2, %cst {dimension_numbers = #tpu.dot_dimension_numbers<[1], [0], [0], [1], [0, 0, 1, 1], [], []>} : vector<3x4xf32>, vector<4x256xf32>, vector<3x256xf32> -> vector<3x256xf32>
    %c0_4 = arith.constant 0 : index
    %c0_5 = arith.constant 0 : index
    %4 = vector.load %arg4[%c0_4, %c0_5] : memref<3x1xf32, #tpu.memory_space<vmem>>, vector<3x1xf32>
    %5 = vector.broadcast %4 : vector<3x1xf32> to vector<3x256xf32>
    %6 = arith.addf %3, %5 : vector<3x256xf32>
    %c0_6 = arith.constant 0 : index
    %c0_7 = arith.constant 0 : index
    %c0_8 = arith.constant 0 : index
    %7 = vector.load %arg5[%c0_6, %c0_7, %c0_8] : memref<1x3x256xf32, #tpu.memory_space<vmem>>, vector<1x3x256xf32>
    %8 = vector.shape_cast %7 : vector<1x3x256xf32> to vector<3x256xf32>
    %9 = vector.shape_cast %6 : vector<3x256xf32> to vector<1x3x256xf32>
    tpu.vector_store %arg5[%c0_6, %c0_7, %c0_8], %9 {strides = array<i32>} : memref<1x3x256xf32, #tpu.memory_space<vmem>>, vector<1x3x256xf32>,
    return
  }
  func.func @transform_0(%arg0: i32, %arg1: i32) -> (i32, i32, i32) {
    %c0_i32 = arith.constant 0 : i32
    %c0_i32_0 = arith.constant 0 : i32
    return %arg1, %c0_i32, %arg0 : i32, i32, i32
  }
  func.func @transform_1(%arg0: i32, %arg1: i32) -> (i32, i32) {
    %c0_i32 = arith.constant 0 : i32
    %c0_i32_0 = arith.constant 0 : i32
    %c0_i32_1 = arith.constant 0 : i32
    return %c0_i32, %c0_i32_0 : i32, i32
  }
  func.func @transform_2(%arg0: i32, %arg1: i32) -> (i32, i32) {
    %c0_i32 = arith.constant 0 : i32
    %c0_i32_0 = arith.constant 0 : i32
    %c0_i32_1 = arith.constant 0 : i32
    return %c0_i32, %c0_i32_0 : i32, i32
  }
  func.func @transform_3(%arg0: i32, %arg1: i32) -> (i32, i32, i32) {
    %c0_i32 = arith.constant 0 : i32
    %c0_i32_0 = arith.constant 0 : i32
    return %arg1, %c0_i32, %arg0 : i32, i32, i32
  }
}

</mosaic_0001>

<bundles_post_ra>
// kernel: outconv_forward.1
= control target key start
LH: loop header
LB: loop body
LE: loop exit
PB: predicated region body
PF: predicated region fallthrough
CT: control target
= control target key end

     0   :  { %s452_s12 = smov 0   ;;  %s454_s13 = smov 0   ;;  %s494_s0 = inlined_call_operand.vmem [shape: f32[2,4,256], index: 0, kind: input, shape index: {}]   ;;  %s495_s1 = inlined_call_operand.vmem [shape: f32[3,4], index: 1, kind: input, shape index: {}]   ;;  %s496_s2 = inlined_call_operand.vmem [shape: f32[3,1], index: 2, kind: input, shape index: {}]   ;;  %s497_s3 = inlined_call_operand.vmem [shape: f32[2,3,256], index: 3, kind: output, shape index: {}]  }
   0x1   :  { %s456_s14 = smov 0  }
   0x2 LB: > { %s22_s15 = sadd.s32 1, %s425_s13  ;;  %p368_p0 = scmp.ge.s32.totalorder %s429_s14, 1  ;;  %s429_s14 = sphi %s456_s14, %s13_s14   ;;  %s425_s13 = sphi %s454_s13, %s499_s13   ;;  %s421_s12 = sphi %s452_s12, %s498_s12  }
   0x3   : > { %p23_p1 = scmp.ge.s32.totalorder %s22_s15, 2  ;;  %p158_p2 = scmp.lt.s32.totalorder %s429_s14, 3 }
   0x5   : > { %s501_s15 = smov (%p23_p1, %s22_s15), 0  ;;  %p159_p3 = pnand %p368_p0, %p158_p2 }
   0x6   : > { %p191_p4 = scmp.lt.s32.totalorder (!%p159_p3), %s421_s12, 1 }
   0x7   : > { %162 = sbr.rel (%p159_p3) target bundleno = 157 (0x9d), region = 32 }
   0xc   : > { %v431_v0 = vmov 0   ;;  %v212_v1 = vld [vmem:[%s496_s2] sm:$0x7]  ;;  %s503_s12 = smov (!%p191_p4, %s421_s12), 1  ;;  %vm226_vm0 = vcmask 1043456   ;;  %vm222_vm1 = vcmask 31744  }
   0xd   : > { %406 = vset.pattern.permute.xlu0 %v431_v0  ;;  %s379_s18 = sshll.u32 %s503_s12, 3  ;;  %v210_v3 = vld [vmem:[%s495_s1] sm:$0x7] }
   0xe   : > { %215 = vperm.xlu0 %406, %v212_v1   ;;  %s198_s21 = scalar_lea.vmem %s494_s0, %s379_s18  ;;  %s208_s26 = scalar_lea.vmem %s497_s3, %s379_s18 }
   0xf   : > { %v211_v2 = vld [vmem:[%s198_s21] sm:$0xff] }
  0x10   : > { %219 = vst [vmem:[#allocation1] ss:$2 sm:$0xff] %v211_v2 }
  0x17   : > { %v220_v4 = vld.sshfl [vmem:[#allocation1] sm:$0xff pattern:$0x75316420]  ;;  %v221_v5 = vld.sshfl [vmem:[#allocation1 + $0x8] sm:$0xff pattern:$0x75316420] }
  0x18   : > { %373 = vmatpush.msk.msra.mxu0 %vm226_vm0, %v220_v4  ;;  %375 = vmatpush.msk.msra.mxu1 %vm226_vm0, %v221_v5 }
  0x19   : > { %374 = vmatmul.msk.f32.vlgmr.msra.gmra.mxu0 %vm222_vm1, %v210_v3  ;;  %376 = vmatmul.msk.f32.vlgmr.msra.gmra.mxu1 %vm222_vm1, %v210_v3 }
  0x80   : > { %v216_v6 = vpop.permute.xlu0 %215 }
  0x96   : > { %v248_v7 = vpop.f32.mrf.mxu0  ;;  %v268_v8 = vpop.f32.mrf.mxu1 }
  0x97   : > { %v269_v9 = vadd.f32 %v268_v8, %v216_v6  ;;  %v249_v10 = vadd.f32 %v248_v7, %v216_v6 }
  0x99   : > { %v273_v11 = vrot.slane %v269_v9, 4 }
  0x9b   : > { %v274_v12 = vsel %vm226_vm0, %v249_v10, %v273_v11 }
  0x9c   : > { %276 = vst [vmem:[%s208_s26] sm:$0x77] %v274_v12 }
  0x9d PF: > { %s13_s14 = sadd.s32 1, %s429_s14   ;;  %s498_s12 = smov %s425_s13 }
  0x9e   : > { %p10_p5 = scmp.ge.s32.totalorder %s13_s14, 4   ;;  %s499_s13 = smov %s501_s15 }
  0xa0   :  { %12 = sbr.rel (!%p10_p5) target bundleno = 2 (0x2), region = 62 }

</bundles_post_ra>
